<compile_context>
chip_gen: v7x
topology: tpu7x:2x2x1
jax: 0.10.0
libtpu: 0.0.40
codegen_flags: <defaults>
</compile_context>

<pallas_src>
import functools
import math

import jax
import jax.numpy as jnp
from jax.experimental import pallas as pl
from jax.experimental.pallas import tpu as pltpu


def _round_up(n, m):
    return ((n + m - 1) // m) * m


def _default_act_dtype():
    """bf16 activations on chips with a bf16 VPU/EUP (v6e/v7x), else f32."""
    try:
        kind = jax.devices()[0].device_kind.lower()
    except Exception:  # pragma: no cover - defensive
        return jnp.float32
    if "v6" in kind or "v7" in kind:
        return jnp.bfloat16
    return jnp.float32


def _mlp_policy_kernel(*refs, discrete, n_hidden, act_dtype):
    """One batch tile through the whole MLP. Weights are VMEM-resident."""
    if n_hidden > 0:
        (x_ref, w_in_ref, b_in_ref, w_h_ref, b_h_ref,
         w_out_ref, b_out_ref, out_ref) = refs
    else:
        x_ref, w_in_ref, b_in_ref, w_out_ref, b_out_ref, out_ref = refs
        w_h_ref = b_h_ref = None

    act = (lambda v: jnp.maximum(v, 0.0)) if discrete else jnp.tanh

    # Cast the streamed x tile to bf16 in-kernel (no wrapper-side HBM round trip).
    x = x_ref[...].astype(jnp.bfloat16)

    # fc_in: bf16 MXU matmul, f32 accumulate; bias add in f32; activation in
    # act_dtype (bf16 on v6e/v7x, f32 on v5e); bf16 feeding the next dot.
    z = jnp.dot(x, w_in_ref[...], preferred_element_type=jnp.float32) + b_in_ref[...]
    h = act(z.astype(act_dtype)).astype(jnp.bfloat16)

    if n_hidden > 0:
        b_h_all = b_h_ref[...]              # hoist bias read out of the loop
        for i in range(n_hidden):           # static unroll; n_hidden is small
            z = (jnp.dot(h, w_h_ref[i], preferred_element_type=jnp.float32)
                 + b_h_all[i])
            h = act(z.astype(act_dtype)).astype(jnp.bfloat16)

    # fc_out (no activation); f32 store at natural ac_dim width.
    out_ref[...] = (jnp.dot(h, w_out_ref[...], preferred_element_type=jnp.float32)
                    + b_out_ref[...]).astype(out_ref.dtype)


def policy_forward(x, params, *, discrete, tile_b=2048, act_dtype=None):
    """Runs the Pallas kernel; returns (output, log_std) like Policy.forward."""
    if act_dtype is None:
        act_dtype = _default_act_dtype()

    batch, ob_dim = x.shape
    size = params["w_in"].shape[1]
    ac_dim = params["w_out"].shape[1]
    n_hidden = params["w_hidden"].shape[0]

    # Batch tile: large (per-grid-step fixed cost dominates once feature padding
    # is gone), but capped so the grid has >= 2 steps when the batch allows, so
    # the parallel batch axis shards across both v7x TensorCores.  Always a
    # multiple of 8 sublanes.
    tb = max(8, min(tile_b, _round_up(pl.cdiv(batch, 2), 8)))
    grid = (pl.cdiv(batch, tb),)

    in_specs = [
        pl.BlockSpec((tb, ob_dim), lambda i: (i, 0)),              # x (streams)
        pl.BlockSpec(params["w_in"].shape, lambda i: (0, 0)),      # w_in (resident)
        pl.BlockSpec(params["b_in"].shape, lambda i: (0, 0)),      # b_in (resident)
    ]
    args = [x, params["w_in"], params["b_in"]]
    if n_hidden > 0:
        in_specs += [
            pl.BlockSpec(params["w_hidden"].shape, lambda i: (0, 0, 0)),
            pl.BlockSpec(params["b_hidden"].shape, lambda i: (0, 0, 0)),
        ]
        args += [params["w_hidden"], params["b_hidden"]]
    in_specs += [
        pl.BlockSpec(params["w_out"].shape, lambda i: (0, 0)),     # w_out (resident)
        pl.BlockSpec(params["b_out"].shape, lambda i: (0, 0)),     # b_out (resident)
    ]
    args += [params["w_out"], params["b_out"]]

    # Advisory cost estimate for XLA's scheduler.
    flops = 2 * batch * (ob_dim * size + n_hidden * size * size + size * ac_dim)
    transcendentals = 0 if discrete else batch * size * (n_hidden + 1)
    weight_bytes = sum(int(a.size) * a.dtype.itemsize for a in args[1:])
    bytes_accessed = (int(x.size) * x.dtype.itemsize
                      + batch * ac_dim * 4 + weight_bytes)

    kernel = functools.partial(_mlp_policy_kernel, discrete=discrete,
                               n_hidden=n_hidden, act_dtype=act_dtype)

    out = pl.pallas_call(
        kernel,
        out_shape=jax.ShapeDtypeStruct((batch, ac_dim), jnp.float32),
        grid=grid,
        in_specs=in_specs,
        out_specs=pl.BlockSpec((tb, ac_dim), lambda i: (i, 0)),
        compiler_params=pltpu.CompilerParams(
            dimension_semantics=("parallel",),      # megacore shard on v7x
            vmem_limit_bytes=32 * 1024 * 1024),     # headroom over v5e default
        cost_estimate=pl.CostEstimate(flops=flops,
                                      transcendentals=transcendentals,
                                      bytes_accessed=bytes_accessed),
    )(*args)

    log_std = None if discrete else params["log_std"]
    return out, log_std


def init_params(key, ob_dim, size, ac_dim, n_layers, *, discrete):
    """PyTorch-Linear-style uniform init at natural (unpadded) sizes.

    Weights are stored transposed vs nn.Linear ((in, out), bf16); biases are
    (1, out) f32 rows.  Hidden layers are stacked along a leading axis.
    """
    assert n_layers > 0 and size > 0
    keys = jax.random.split(key, 2 * (n_layers + 1) + 1)

    def linear(kw, kb, fan_in, fan_out):
        bound = 1.0 / math.sqrt(fan_in)
        w = jax.random.uniform(kw, (fan_in, fan_out), jnp.float32, -bound, bound)
        b = jax.random.uniform(kb, (fan_out,), jnp.float32, -bound, bound)
        return w.astype(jnp.bfloat16), b.reshape(1, fan_out)

    w_in, b_in = linear(keys[0], keys[1], ob_dim, size)

    wh, bh = [], []
    for i in range(n_layers - 1):
        w, b = linear(keys[2 + 2 * i], keys[3 + 2 * i], size, size)
        wh.append(w[None])
        bh.append(b[None])
    if n_layers - 1 > 0:
        w_hidden = jnp.concatenate(wh, axis=0)     # (L-1, size, size) bf16
        b_hidden = jnp.concatenate(bh, axis=0)     # (L-1, 1, size) f32
    else:
        w_hidden = jnp.zeros((0, size, size), jnp.bfloat16)
        b_hidden = jnp.zeros((0, 1, size), jnp.float32)

    w_out, b_out = linear(keys[2 * n_layers], keys[2 * n_layers + 1], size, ac_dim)

    params = dict(w_in=w_in, b_in=b_in, w_hidden=w_hidden, b_hidden=b_hidden,
                  w_out=w_out, b_out=b_out)
    if not discrete:
        # mirrors nn.Parameter(torch.rand(ac_dim))
        params["log_std"] = jax.random.uniform(keys[-1], (ac_dim,), jnp.float32)
    return params


def _reference_forward(x, params, *, discrete, act_dtype):
    """Pure-JAX reference mirroring the kernel's dtype choices exactly."""
    act = (lambda v: jnp.maximum(v, 0.0)) if discrete else jnp.tanh
    h = x.astype(jnp.bfloat16)
    z = (jnp.dot(h, params["w_in"], preferred_element_type=jnp.float32)
         + params["b_in"])
    h = act(z.astype(act_dtype)).astype(jnp.bfloat16)
    for i in range(params["w_hidden"].shape[0]):
        z = (jnp.dot(h, params["w_hidden"][i], preferred_element_type=jnp.float32)
             + params["b_hidden"][i])
        h = act(z.astype(act_dtype)).astype(jnp.bfloat16)
    return (jnp.dot(h, params["w_out"], preferred_element_type=jnp.float32)
            + params["b_out"])


if __name__ == "__main__":
    key = jax.random.PRNGKey(0)
    act_dtype = _default_act_dtype()
    tol = 2e-2 if act_dtype == jnp.bfloat16 else 2e-3

    # --- Case 1: continuous policy, n_layers=2 (one hidden layer), tanh. ---
    batch, ob_dim, size, ac_dim, n_layers = 8, 16, 32, 4, 2
    k_x, k_p, key = jax.random.split(key, 3)
    x = jax.random.normal(k_x, (batch, ob_dim), jnp.float32)
    params = init_params(k_p, ob_dim, size, ac_dim, n_layers, discrete=False)

    out, log_std = policy_forward(x, params, discrete=False, act_dtype=act_dtype)
    out = jax.block_until_ready(out)
    ref = _reference_forward(x, params, discrete=False, act_dtype=act_dtype)
    assert out.shape == (batch, ac_dim)
    assert jnp.allclose(out, ref, atol=tol, rtol=tol), \
        float(jnp.max(jnp.abs(out - ref)))
    assert log_std is not None and log_std.shape == (ac_dim,)

    # --- Case 2: discrete policy, n_layers=1 (no hidden stack), relu,
    #     batch large enough for a 2-step grid with a ragged last tile. ---
    batch2, ob_dim2, size2, ac_dim2, n_layers2 = 1000, 16, 32, 6, 1
    k_x2, k_p2, key = jax.random.split(key, 3)
    x2 = jax.random.normal(k_x2, (batch2, ob_dim2), jnp.float32)
    params2 = init_params(k_p2, ob_dim2, size2, ac_dim2, n_layers2, discrete=True)

    out2, log_std2 = policy_forward(x2, params2, discrete=True, act_dtype=act_dtype)
    out2 = jax.block_until_ready(out2)
    ref2 = _reference_forward(x2, params2, discrete=True, act_dtype=act_dtype)
    assert out2.shape == (batch2, ac_dim2)
    assert jnp.allclose(out2, ref2, atol=tol, rtol=tol), \
        float(jnp.max(jnp.abs(out2 - ref2)))
    assert log_std2 is None

    print("KERNEL_OK")
</pallas_src>

<mosaic_0001>
module attributes {stable_mosaic.version = 11 : i64} {
  func.func @_mlp_policy_kernel(%arg0: i32, %arg1: memref<8x16xf32, #tpu.memory_space<vmem>>, %arg2: memref<16x32xbf16, #tpu.memory_space<vmem>>, %arg3: memref<1x32xf32, #tpu.memory_space<vmem>>, %arg4: memref<1x32x32xbf16, #tpu.memory_space<vmem>>, %arg5: memref<1x1x32xf32, #tpu.memory_space<vmem>>, %arg6: memref<32x4xbf16, #tpu.memory_space<vmem>>, %arg7: memref<1x4xf32, #tpu.memory_space<vmem>>, %arg8: memref<8x4xf32, #tpu.memory_space<vmem>>) attributes {dimension_semantics = [#tpu.dimension_semantics<parallel>], iteration_bounds = array<i64: 1>, scalar_prefetch = 0 : i64, scratch_operands = 0 : i64, tpu.core_type = #tpu.core_type<tc>, window_params = [{transform_indices = @transform_0, window_bounds = array<i64: 8, 16>}, {pipeline_mode = #tpu.pipeline_mode<synchronous>, transform_indices = @transform_1, window_bounds = array<i64: 16, 32>}, {pipeline_mode = #tpu.pipeline_mode<synchronous>, transform_indices = @transform_2, window_bounds = array<i64: 1, 32>}, {pipeline_mode = #tpu.pipeline_mode<synchronous>, transform_indices = @transform_3, window_bounds = array<i64: 1, 32, 32>}, {pipeline_mode = #tpu.pipeline_mode<synchronous>, transform_indices = @transform_4, window_bounds = array<i64: 1, 1, 32>}, {pipeline_mode = #tpu.pipeline_mode<synchronous>, transform_indices = @transform_5, window_bounds = array<i64: 32, 4>}, {pipeline_mode = #tpu.pipeline_mode<synchronous>, transform_indices = @transform_6, window_bounds = array<i64: 1, 4>}, {transform_indices = @transform_7, window_bounds = array<i64: 8, 4>}]} {
    %c0 = arith.constant 0 : index
    %c0_0 = arith.constant 0 : index
    %0 = vector.load %arg1[%c0, %c0_0] : memref<8x16xf32, #tpu.memory_space<vmem>>, vector<8x16xf32>
    %1 = arith.truncf %0 : vector<8x16xf32> to vector<8x16xbf16>
    %c0_1 = arith.constant 0 : index
    %c0_2 = arith.constant 0 : index
    %2 = vector.load %arg2[%c0_1, %c0_2] : memref<16x32xbf16, #tpu.memory_space<vmem>>, vector<16x32xbf16>
    %cst = arith.constant dense<0.000000e+00> : vector<8x32xf32>
    %3 = tpu.matmul %1, %2, %cst {dimension_numbers = #tpu.dot_dimension_numbers<[1], [0], [0], [1], [0, 0, 1, 1], [], []>} : vector<8x16xbf16>, vector<16x32xbf16>, vector<8x32xf32> -> vector<8x32xf32>
    %c0_3 = arith.constant 0 : index
    %c0_4 = arith.constant 0 : index
    %4 = vector.load %arg3[%c0_3, %c0_4] : memref<1x32xf32, #tpu.memory_space<vmem>>, vector<1x32xf32>
    %5 = vector.broadcast %4 : vector<1x32xf32> to vector<8x32xf32>
    %6 = arith.addf %3, %5 : vector<8x32xf32>
    %7 = math.tanh %6 : vector<8x32xf32>
    %8 = arith.truncf %7 : vector<8x32xf32> to vector<8x32xbf16>
    %c0_5 = arith.constant 0 : index
    %c0_6 = arith.constant 0 : index
    %c0_7 = arith.constant 0 : index
    %9 = vector.load %arg5[%c0_5, %c0_6, %c0_7] : memref<1x1x32xf32, #tpu.memory_space<vmem>>, vector<1x1x32xf32>
    %c0_8 = arith.constant 0 : index
    %c0_9 = arith.constant 0 : index
    %c0_10 = arith.constant 0 : index
    %10 = vector.load %arg4[%c0_8, %c0_9, %c0_10] : memref<1x32x32xbf16, #tpu.memory_space<vmem>>, vector<1x32x32xbf16>
    %11 = vector.shape_cast %10 : vector<1x32x32xbf16> to vector<32x32xbf16>
    %cst_11 = arith.constant dense<0.000000e+00> : vector<8x32xf32>
    %12 = tpu.matmul %8, %11, %cst_11 {dimension_numbers = #tpu.dot_dimension_numbers<[1], [0], [0], [1], [0, 0, 1, 1], [], []>} : vector<8x32xbf16>, vector<32x32xbf16>, vector<8x32xf32> -> vector<8x32xf32>
    %13 = vector.shape_cast %9 : vector<1x1x32xf32> to vector<1x32xf32>
    %14 = vector.broadcast %13 : vector<1x32xf32> to vector<8x32xf32>
    %15 = arith.addf %12, %14 : vector<8x32xf32>
    %16 = math.tanh %15 : vector<8x32xf32>
    %17 = arith.truncf %16 : vector<8x32xf32> to vector<8x32xbf16>
    %c0_12 = arith.constant 0 : index
    %c0_13 = arith.constant 0 : index
    %18 = vector.load %arg6[%c0_12, %c0_13] : memref<32x4xbf16, #tpu.memory_space<vmem>>, vector<32x4xbf16>
    %cst_14 = arith.constant dense<0.000000e+00> : vector<8x4xf32>
    %19 = tpu.matmul %17, %18, %cst_14 {dimension_numbers = #tpu.dot_dimension_numbers<[1], [0], [0], [1], [0, 0, 1, 1], [], []>} : vector<8x32xbf16>, vector<32x4xbf16>, vector<8x4xf32> -> vector<8x4xf32>
    %c0_15 = arith.constant 0 : index
    %c0_16 = arith.constant 0 : index
    %20 = vector.load %arg7[%c0_15, %c0_16] : memref<1x4xf32, #tpu.memory_space<vmem>>, vector<1x4xf32>
    %21 = vector.broadcast %20 : vector<1x4xf32> to vector<8x4xf32>
    %22 = arith.addf %19, %21 : vector<8x4xf32>
    %c0_17 = arith.constant 0 : index
    %c0_18 = arith.constant 0 : index
    %23 = vector.load %arg8[%c0_17, %c0_18] : memref<8x4xf32, #tpu.memory_space<vmem>>, vector<8x4xf32>
    tpu.vector_store %arg8[%c0_17, %c0_18], %22 {strides = array<i32>} : memref<8x4xf32, #tpu.memory_space<vmem>>, vector<8x4xf32>,
    return
  }
  func.func @transform_0(%arg0: i32) -> (i32, i32) {
    %c0_i32 = arith.constant 0 : i32
    %c0_i32_0 = arith.constant 0 : i32
    return %arg0, %c0_i32 : i32, i32
  }
  func.func @transform_1(%arg0: i32) -> (i32, i32) {
    %c0_i32 = arith.constant 0 : i32
    %c0_i32_0 = arith.constant 0 : i32
    %c0_i32_1 = arith.constant 0 : i32
    return %c0_i32, %c0_i32_0 : i32, i32
  }
  func.func @transform_2(%arg0: i32) -> (i32, i32) {
    %c0_i32 = arith.constant 0 : i32
    %c0_i32_0 = arith.constant 0 : i32
    %c0_i32_1 = arith.constant 0 : i32
    return %c0_i32, %c0_i32_0 : i32, i32
  }
  func.func @transform_3(%arg0: i32) -> (i32, i32, i32) {
    %c0_i32 = arith.constant 0 : i32
    %c0_i32_0 = arith.constant 0 : i32
    %c0_i32_1 = arith.constant 0 : i32
    %c0_i32_2 = arith.constant 0 : i32
    return %c0_i32, %c0_i32_0, %c0_i32_1 : i32, i32, i32
  }
  func.func @transform_4(%arg0: i32) -> (i32, i32, i32) {
    %c0_i32 = arith.constant 0 : i32
    %c0_i32_0 = arith.constant 0 : i32
    %c0_i32_1 = arith.constant 0 : i32
    %c0_i32_2 = arith.constant 0 : i32
    return %c0_i32, %c0_i32_0, %c0_i32_1 : i32, i32, i32
  }
  func.func @transform_5(%arg0: i32) -> (i32, i32) {
    %c0_i32 = arith.constant 0 : i32
    %c0_i32_0 = arith.constant 0 : i32
    %c0_i32_1 = arith.constant 0 : i32
    return %c0_i32, %c0_i32_0 : i32, i32
  }
  func.func @transform_6(%arg0: i32) -> (i32, i32) {
    %c0_i32 = arith.constant 0 : i32
    %c0_i32_0 = arith.constant 0 : i32
    %c0_i32_1 = arith.constant 0 : i32
    return %c0_i32, %c0_i32_0 : i32, i32
  }
  func.func @transform_7(%arg0: i32) -> (i32, i32) {
    %c0_i32 = arith.constant 0 : i32
    %c0_i32_0 = arith.constant 0 : i32
    return %arg0, %c0_i32 : i32, i32
  }
}

</mosaic_0001>

<bundles_post_ra>
// kernel: tpu_custom_call.1
= control target key start
LH: loop header
LB: loop body
LE: loop exit
PB: predicated region body
PF: predicated region fallthrough
CT: control target
= control target key end

     0   :  { %12 = vsyncpa [#allocation3], 0  ;;  %s325_s24 = smov [#allocation2]   ;;  %s411_s0 = inlined_call_operand.vmem [shape: f32[8,16], index: 0, kind: input, shape index: {}]   ;;  %s412_s1 = inlined_call_operand.hbm [shape: bf16[16,32], index: 1, kind: input, shape index: {}]   ;;  %s413_s2 = inlined_call_operand.vmem [shape: f32[1,32], index: 2, kind: input, shape index: {}]   ;;  %s414_s3 = inlined_call_operand.vmem [shape: bf16[1,32,32], index: 3, kind: input, shape index: {}]   ;;  %s415_s4 = inlined_call_operand.vmem [shape: f32[1,1,32], index: 4, kind: input, shape index: {}]   ;;  %s416_s5 = inlined_call_operand.vmem [shape: bf16[32,4], index: 5, kind: input, shape index: {}]   ;;  %s417_s6 = inlined_call_operand.vmem [shape: f32[1,4], index: 6, kind: input, shape index: {}]   ;;  %s418_s7 = inlined_call_operand.vmem [shape: f32[8,4], index: 7, kind: output, shape index: {}]  }
   0x1   :  { %s20_s25 = sshll.u32 %s325_s24, 4  ;;  %s301_s28 = scalar_lea.hbm %s412_s1, 128  ;;  %s21_s25 = int_to_ptr.vmem [resolvable:$true] %s20_s25 }
   0x2   :  { %p302_p0 = scmp.ne.s32.totalorder %s412_s1, %s301_s28  ;;  %p305_p1 = scmp.lt.u32.totalorder %s301_s28, %s412_s1 }
   0x4   :  { %p307_p2 = pnand %p305_p1, %p302_p0 }
   0x6   :  { %310 = shalt.err (!%p307_p2)
}
   0x7   :  { %s311_s10 = scalar_lea.vmem %s21_s25, 128  ;;  %p316_p4 = scmp.lt.s32.totalorder %s21_s25, %s21_s25 }
   0x8   :  { %p312_p3 = scmp.ne.s32.totalorder %s21_s25, %s311_s10  ;;  %p317_p5 = scmp.lt.s32.totalorder %s311_s10, %s311_s10 }
   0xa   :  { %p318_p6 = por %p317_p5, %p316_p4 }
   0xc   :  { %p319_p7 = pnand %p318_p6, %p312_p3 }
   0xe   :  { %322 = shalt.err (!%p319_p7)
}
   0xf   :  { %s326_s11 = smov 64   ;;  %s327_s12 = smov 4  }
  0x10   :  { %26 = dma.hbm_to_vmem [thread:$0]  %s412_s1, 128, %s21_s25, [#allocation3], %s326_s11, %s326_s11, %s327_s12  }
  0x11   :  { %323 = dma.done.wait [#allocation3], 128  }
  0x12   :  { %324 = vsyncadd [#allocation3], 4294967168  ;;  %v328_v0 = vmov 0.0   ;;  %vm329_vm0 = vmmov 0   ;;  %v292_v1 = vld [vmem:[#allocation2] sm:$0xff]   ;;  %vm58_vm1 = vcmask 130048  }
  0x13   :  { %265 = vmatprep.subr.bf16.mxu0 %v328_v0  ;;  %267 = vmatprep.mubr.msk.bf16.mxu0 %vm329_vm0, %v328_v0  ;;  %v41_v2 = vld [vmem:[%s411_s0] sm:$0xff]  ;;  %v294_v5 = vld [vmem:[%s414_s3 + $0x8] sm:$0xff]   ;;  %vm127_vm2 = vcmask 261120   ;;  %vm239_vm3 = vcmask 31744  }
  0x14   :  { %271 = vmatprep.subr.bf16.mxu1 %v328_v0  ;;  %275 = vmatprep.mubr.msk.bf16.mxu1 %vm329_vm0, %v328_v0  ;;  %v42_v3 = vpack.c.bf16 %v41_v2, %v41_v2  ;;  %v293_v4 = vld [vmem:[%s414_s3] sm:$0xff]   ;;  %v296_v15 = vld [vmem:[%s416_s5 + $0x8] sm:$0xff]  }
  0x15   :  { %266 = vmatpush3.bf16.msra.mxu0 %v292_v1  ;;  %272 = vmatpush3.bf16.msra.mxu1 %v293_v4  ;;  %v246_v6 = vld [vmem:[%s413_s2] ss:$0 sm:$0xff] }
  0x16   :  { %279 = vmatprep.subr.bf16.mxu0 %v328_v0  ;;  %273 = vmatprep.subr.bf16.mxu1 %v328_v0  ;;  %v295_v14 = vld [vmem:[%s416_s5] sm:$0xff]  }
  0x17   :  { %v249_v16 = vld [vmem:[%s415_s4] ss:$0 sm:$0xff] }
  0x18   :  { %268 = vmatmul.mubr.msk.bf16.vlgmr.msra.gmra.mrb[0].mxu0 %vm58_vm1, %v42_v3  ;;  %v253_v24 = vld [vmem:[%s417_s6] ss:$0 sm:$0xff] }
  0x19   :  { %283 = vmatprep.mubr.msk.bf16.mxu0 %vm329_vm0, %v328_v0  ;;  %274 = vmatpush3.bf16.msra.mxu1 %v294_v5 }
  0x1a   :  { %280 = vmatpush3.bf16.msra.mxu0 %v295_v14 }
  0x1b   :  { %281 = vmatprep.subr.bf16.mxu0 %v328_v0 }
  0x1e   :  { %282 = vmatpush3.bf16.msra.mxu0 %v296_v15 }
  0xeb   :  { %v96_v7 = vpop.f32.mrb[0].mxu0 }
  0xec   :  { %v97_v8 = vadd.f32 %v246_v6, %v96_v7  ;;  %v269_v9 = vpop.f32.mrb[1].mxu0 }
  0xed   :  { %v99_v10 = vpop.f32.mrb[2].mxu0 }
  0xee   :  { %297 = vtanh.f32 %v97_v8  ;;  %v270_v11 = vpop.f32.mrb[3].mxu0 }
  0xf8   :  { %v298_v12 = vpop.eup %297 }
  0xf9   :  { %v103_v13 = vpack.c.bf16 %v298_v12, %v298_v12 }
  0xfb   :  { %276 = vmatmul.mubr.msk.bf16.vlgmr.msra.gmra.mrb[0].mxu1 %vm127_vm2, %v103_v13 }
 0x1ce   :  { %v165_v17 = vpop.f32.mrb[0].mxu1 }
 0x1cf   :  { %v166_v18 = vadd.f32 %v249_v16, %v165_v17  ;;  %v277_v19 = vpop.f32.mrb[1].mxu1 }
 0x1d0   :  { %v168_v20 = vpop.f32.mrb[2].mxu1 }
 0x1d1   :  { %299 = vtanh.f32 %v166_v18  ;;  %v278_v21 = vpop.f32.mrb[3].mxu1 }
 0x1db   :  { %v300_v22 = vpop.eup %299 }
 0x1dc   :  { %v172_v23 = vpack.c.bf16 %v300_v22, %v300_v22 }
 0x1de   :  { %284 = vmatmul.mubr.msk.bf16.vlgmr.msra.gmra.mrb[4].mxu0 %vm127_vm2, %v172_v23 }
 0x2b1   :  { %v233_v25 = vpop.f32.mrb[4].mxu0 }
 0x2b2   :  { %v234_v26 = vadd.f32 %v253_v24, %v233_v25  ;;  %v285_v27 = vpop.f32.mrb[5].mxu0 }
 0x2b3   :  { %v236_v28 = vpop.f32.mrb[6].mxu0 }
 0x2b4   :  { %240 = vst.msk [vmem:[%s418_s7] sm:$0xff] %vm239_vm3, %v234_v26  ;;  %v286_v29 = vpop.f32.mrb[7].mxu0 }
 0x2b5   :  { %245 = vsyncpa [#allocation3], 1 }

</bundles_post_ra>
